<compile_context>
chip_gen: v5e
topology: v5e:2x2
jax: 0.10.0
libtpu: 0.0.40
codegen_flags: <defaults>
</compile_context>

<pallas_src>
import jax
import jax.numpy as jnp
from jax import lax
from jax.experimental import pallas as pl
from jax.experimental.pallas import tpu as pltpu


def _lstm_kernel(xproj_ref, whh_ref, out_ref):
    """Full LSTM recurrence in one kernel invocation.

    xproj_ref: (T, B, 4H) f32  -- precomputed x_t * W_ih^T + (b_ih + b_hh),
                                  gate columns permuted to [i, f, o, g].
    whh_ref:   (H, 4H)  f32    -- W_hh^T with the same gate permutation.
    out_ref:   (B, H)   f32    -- final hidden state h_T.
    """
    T, B, _ = xproj_ref.shape
    H = whh_ref.shape[0]

    whh = whh_ref[...]  # resident in vregs/VMEM across the whole recurrence

    def step(t, carry):
        h, c = carry
        # gates: (B, 4H) = precomputed input projection + recurrent matmul
        gates = xproj_ref[t] + jnp.dot(h, whh, preferred_element_type=jnp.float32)
        s = jax.nn.sigmoid(gates[:, : 3 * H])   # one wide sigmoid: [i | f | o]
        g = jnp.tanh(gates[:, 3 * H:])          # one tanh: g
        i_g = s[:, 0 * H:1 * H]
        f_g = s[:, 1 * H:2 * H]
        o_g = s[:, 2 * H:3 * H]
        c_new = f_g * c + i_g * g
        h_new = o_g * jnp.tanh(c_new)
        return h_new, c_new

    h0 = jnp.zeros((B, H), jnp.float32)
    c0 = jnp.zeros((B, H), jnp.float32)
    h_fin, _ = lax.fori_loop(0, T, step, (h0, c0), unroll=True)

    out_ref[...] = h_fin


def lstm_forward(x, params):
    """x: (B, T, 1) float32. Returns (B,) float32 (matches out.squeeze())."""
    w_ih, w_hh, b_ih, b_hh, w_lin, b_lin = params
    B, T, _ = x.shape
    H = w_hh.shape[1]

    # Permute PyTorch gate order [i, f, g, o] -> [i, f, o, g] so the kernel can
    # apply one contiguous sigmoid over [0:3H] and one tanh over [3H:4H].
    perm = jnp.concatenate([
        jnp.arange(0 * H, 1 * H),
        jnp.arange(1 * H, 2 * H),
        jnp.arange(3 * H, 4 * H),
        jnp.arange(2 * H, 3 * H),
    ])
    w_ih_p = w_ih[perm]                 # (4H, 1)
    w_hh_p = w_hh[perm]                 # (4H, H)
    b_p = (b_ih + b_hh)[perm]           # (4H,)

    # Pad batch to a multiple of 8 sublanes (padded rows are independent and
    # simply sliced off afterwards).
    B_pad = max(8, ((B + 7) // 8) * 8)
    x_tb = jnp.transpose(x[..., 0], (1, 0)).astype(jnp.float32)   # (T, B)
    x_tb = jnp.pad(x_tb, ((0, 0), (0, B_pad - B)))                # (T, B_pad)

    # Hoisted input projection: input_size == 1, so x @ W_ih^T is just a
    # broadcast multiply. Bias is fused in here once for all timesteps.
    xproj = (x_tb[:, :, None] * w_ih_p[:, 0][None, None, :]
             + b_p[None, None, :]).astype(jnp.float32)            # (T, B_pad, 4H)

    whh_k = w_hh_p.T.astype(jnp.float32)                          # (H, 4H)

    h_final = pl.pallas_call(
        _lstm_kernel,
        out_shape=jax.ShapeDtypeStruct((B_pad, H), jnp.float32),
        in_specs=[
            pl.BlockSpec(memory_space=pltpu.MemorySpace.VMEM),    # xproj
            pl.BlockSpec(memory_space=pltpu.MemorySpace.VMEM),    # W_hh^T
        ],
        out_specs=pl.BlockSpec(memory_space=pltpu.MemorySpace.VMEM),
    )(xproj, whh_k)

    # Final Linear(H, 1) runs once -> do it in XLA on the lane-dense h.
    out = h_final[:B] @ w_lin.T + b_lin                            # (B, 1)
    return out[:, 0]


def lstm_reference(x, params):
    """Pure-JAX reference matching torch.nn.LSTM + Linear semantics."""
    w_ih, w_hh, b_ih, b_hh, w_lin, b_lin = params
    B, T, _ = x.shape
    H = w_hh.shape[1]
    h = jnp.zeros((B, H), jnp.float32)
    c = jnp.zeros((B, H), jnp.float32)
    for t in range(T):
        gates = x[:, t, :] @ w_ih.T + h @ w_hh.T + b_ih + b_hh
        i = jax.nn.sigmoid(gates[:, 0 * H:1 * H])
        f = jax.nn.sigmoid(gates[:, 1 * H:2 * H])
        g = jnp.tanh(gates[:, 2 * H:3 * H])
        o = jax.nn.sigmoid(gates[:, 3 * H:4 * H])
        c = f * c + i * g
        h = o * jnp.tanh(c)
    out = h @ w_lin.T + b_lin
    return out[:, 0]


def init_params(key, hidden_size):
    """Deterministic init mirroring PyTorch shapes (uniform +/- 1/sqrt(H))."""
    H = hidden_size
    k = 1.0 / jnp.sqrt(jnp.float32(H))
    ks = jax.random.split(key, 6)
    w_ih = jax.random.uniform(ks[0], (4 * H, 1), jnp.float32, -k, k)
    w_hh = jax.random.uniform(ks[1], (4 * H, H), jnp.float32, -k, k)
    b_ih = jax.random.uniform(ks[2], (4 * H,), jnp.float32, -k, k)
    b_hh = jax.random.uniform(ks[3], (4 * H,), jnp.float32, -k, k)
    w_lin = jax.random.uniform(ks[4], (1, H), jnp.float32, -k, k)
    b_lin = jax.random.uniform(ks[5], (1,), jnp.float32, -k, k)
    return (w_ih, w_hh, b_ih, b_hh, w_lin, b_lin)


if __name__ == "__main__":
    B, T, H = 2, 8, 32  # small shapes: batch=2, seq=8, hidden=32, input feature=1

    key = jax.random.PRNGKey(0)
    k_x, k_p = jax.random.split(key)
    x = jax.random.normal(k_x, (B, T, 1), jnp.float32)
    params = init_params(k_p, H)

    out = lstm_forward(x, params)
    out = jax.block_until_ready(out)

    ref = lstm_reference(x, params)
    assert out.shape == (B,), out.shape
    assert jnp.allclose(out, ref, atol=1e-5, rtol=1e-5), (out, ref)

    print("KERNEL_OK")
</pallas_src>

<mosaic_0001>
module attributes {stable_mosaic.version = 11 : i64} {
  func.func @_lstm_kernel(%arg0: memref<8x8x128xf32, #tpu.memory_space<vmem>>, %arg1: memref<32x128xf32, #tpu.memory_space<vmem>>, %arg2: memref<8x32xf32, #tpu.memory_space<vmem>>) attributes {dimension_semantics = [], scalar_prefetch = 0 : i64, scratch_operands = 0 : i64, tpu.core_type = #tpu.core_type<tc>} {
    %c0 = arith.constant 0 : index
    %c0_0 = arith.constant 0 : index
    %0 = vector.load %arg1[%c0, %c0_0] : memref<32x128xf32, #tpu.memory_space<vmem>>, vector<32x128xf32>
    %cst = arith.constant 0.000000e+00 : f32
    %1 = vector.broadcast %cst : f32 to vector<8x32xf32>
    %cst_1 = arith.constant 0.000000e+00 : f32
    %2 = vector.broadcast %cst_1 : f32 to vector<8x32xf32>
    %c0_i32 = arith.constant 0 : i32
    %3 = arith.index_cast %c0_i32 : i32 to index
    %c0_2 = arith.constant 0 : index
    %c0_3 = arith.constant 0 : index
    %4 = vector.load %arg0[%3, %c0_2, %c0_3] : memref<8x8x128xf32, #tpu.memory_space<vmem>>, vector<1x8x128xf32>
    %5 = vector.shape_cast %4 : vector<1x8x128xf32> to vector<8x128xf32>
    %cst_4 = arith.constant dense<0.000000e+00> : vector<8x128xf32>
    %6 = tpu.matmul %1, %0, %cst_4 {dimension_numbers = #tpu.dot_dimension_numbers<[1], [0], [0], [1], [0, 0, 1, 1], [], []>} : vector<8x32xf32>, vector<32x128xf32>, vector<8x128xf32> -> vector<8x128xf32>
    %7 = arith.addf %5, %6 : vector<8x128xf32>
    %8 = vector.extract_strided_slice %7 {offsets = [0, 0], sizes = [8, 96], strides = [1, 1]} : vector<8x128xf32> to vector<8x96xf32>
    %9 = arith.negf %8 : vector<8x96xf32>
    %10 = math.exp %9 : vector<8x96xf32>
    %cst_5 = arith.constant 1.000000e+00 : f32
    %11 = vector.broadcast %cst_5 : f32 to vector<8x96xf32>
    %12 = arith.addf %11, %10 : vector<8x96xf32>
    %13 = arith.divf %11, %12 : vector<8x96xf32>
    %14 = vector.extract_strided_slice %7 {offsets = [0, 96], sizes = [8, 32], strides = [1, 1]} : vector<8x128xf32> to vector<8x32xf32>
    %15 = math.tanh %14 : vector<8x32xf32>
    %16 = vector.extract_strided_slice %13 {offsets = [0, 0], sizes = [8, 32], strides = [1, 1]} : vector<8x96xf32> to vector<8x32xf32>
    %17 = vector.extract_strided_slice %13 {offsets = [0, 32], sizes = [8, 32], strides = [1, 1]} : vector<8x96xf32> to vector<8x32xf32>
    %18 = vector.extract_strided_slice %13 {offsets = [0, 64], sizes = [8, 32], strides = [1, 1]} : vector<8x96xf32> to vector<8x32xf32>
    %19 = arith.mulf %17, %2 : vector<8x32xf32>
    %20 = arith.mulf %16, %15 : vector<8x32xf32>
    %21 = arith.addf %19, %20 : vector<8x32xf32>
    %22 = math.tanh %21 : vector<8x32xf32>
    %23 = arith.mulf %18, %22 : vector<8x32xf32>
    %c1_i32 = arith.constant 1 : i32
    %24 = arith.index_cast %c1_i32 : i32 to index
    %c0_6 = arith.constant 0 : index
    %c0_7 = arith.constant 0 : index
    %25 = vector.load %arg0[%24, %c0_6, %c0_7] : memref<8x8x128xf32, #tpu.memory_space<vmem>>, vector<1x8x128xf32>
    %26 = vector.shape_cast %25 : vector<1x8x128xf32> to vector<8x128xf32>
    %cst_8 = arith.constant dense<0.000000e+00> : vector<8x128xf32>
    %27 = tpu.matmul %23, %0, %cst_8 {dimension_numbers = #tpu.dot_dimension_numbers<[1], [0], [0], [1], [0, 0, 1, 1], [], []>} : vector<8x32xf32>, vector<32x128xf32>, vector<8x128xf32> -> vector<8x128xf32>
    %28 = arith.addf %26, %27 : vector<8x128xf32>
    %29 = vector.extract_strided_slice %28 {offsets = [0, 0], sizes = [8, 96], strides = [1, 1]} : vector<8x128xf32> to vector<8x96xf32>
    %30 = arith.negf %29 : vector<8x96xf32>
    %31 = math.exp %30 : vector<8x96xf32>
    %cst_9 = arith.constant 1.000000e+00 : f32
    %32 = vector.broadcast %cst_9 : f32 to vector<8x96xf32>
    %33 = arith.addf %32, %31 : vector<8x96xf32>
    %34 = arith.divf %32, %33 : vector<8x96xf32>
    %35 = vector.extract_strided_slice %28 {offsets = [0, 96], sizes = [8, 32], strides = [1, 1]} : vector<8x128xf32> to vector<8x32xf32>
    %36 = math.tanh %35 : vector<8x32xf32>
    %37 = vector.extract_strided_slice %34 {offsets = [0, 0], sizes = [8, 32], strides = [1, 1]} : vector<8x96xf32> to vector<8x32xf32>
    %38 = vector.extract_strided_slice %34 {offsets = [0, 32], sizes = [8, 32], strides = [1, 1]} : vector<8x96xf32> to vector<8x32xf32>
    %39 = vector.extract_strided_slice %34 {offsets = [0, 64], sizes = [8, 32], strides = [1, 1]} : vector<8x96xf32> to vector<8x32xf32>
    %40 = arith.mulf %38, %21 : vector<8x32xf32>
    %41 = arith.mulf %37, %36 : vector<8x32xf32>
    %42 = arith.addf %40, %41 : vector<8x32xf32>
    %43 = math.tanh %42 : vector<8x32xf32>
    %44 = arith.mulf %39, %43 : vector<8x32xf32>
    %c2_i32 = arith.constant 2 : i32
    %45 = arith.index_cast %c2_i32 : i32 to index
    %c0_10 = arith.constant 0 : index
    %c0_11 = arith.constant 0 : index
    %46 = vector.load %arg0[%45, %c0_10, %c0_11] : memref<8x8x128xf32, #tpu.memory_space<vmem>>, vector<1x8x128xf32>
    %47 = vector.shape_cast %46 : vector<1x8x128xf32> to vector<8x128xf32>
    %cst_12 = arith.constant dense<0.000000e+00> : vector<8x128xf32>
    %48 = tpu.matmul %44, %0, %cst_12 {dimension_numbers = #tpu.dot_dimension_numbers<[1], [0], [0], [1], [0, 0, 1, 1], [], []>} : vector<8x32xf32>, vector<32x128xf32>, vector<8x128xf32> -> vector<8x128xf32>
    %49 = arith.addf %47, %48 : vector<8x128xf32>
    %50 = vector.extract_strided_slice %49 {offsets = [0, 0], sizes = [8, 96], strides = [1, 1]} : vector<8x128xf32> to vector<8x96xf32>
    %51 = arith.negf %50 : vector<8x96xf32>
    %52 = math.exp %51 : vector<8x96xf32>
    %cst_13 = arith.constant 1.000000e+00 : f32
    %53 = vector.broadcast %cst_13 : f32 to vector<8x96xf32>
    %54 = arith.addf %53, %52 : vector<8x96xf32>
    %55 = arith.divf %53, %54 : vector<8x96xf32>
    %56 = vector.extract_strided_slice %49 {offsets = [0, 96], sizes = [8, 32], strides = [1, 1]} : vector<8x128xf32> to vector<8x32xf32>
    %57 = math.tanh %56 : vector<8x32xf32>
    %58 = vector.extract_strided_slice %55 {offsets = [0, 0], sizes = [8, 32], strides = [1, 1]} : vector<8x96xf32> to vector<8x32xf32>
    %59 = vector.extract_strided_slice %55 {offsets = [0, 32], sizes = [8, 32], strides = [1, 1]} : vector<8x96xf32> to vector<8x32xf32>
    %60 = vector.extract_strided_slice %55 {offsets = [0, 64], sizes = [8, 32], strides = [1, 1]} : vector<8x96xf32> to vector<8x32xf32>
    %61 = arith.mulf %59, %42 : vector<8x32xf32>
    %62 = arith.mulf %58, %57 : vector<8x32xf32>
    %63 = arith.addf %61, %62 : vector<8x32xf32>
    %64 = math.tanh %63 : vector<8x32xf32>
    %65 = arith.mulf %60, %64 : vector<8x32xf32>
    %c3_i32 = arith.constant 3 : i32
    %66 = arith.index_cast %c3_i32 : i32 to index
    %c0_14 = arith.constant 0 : index
    %c0_15 = arith.constant 0 : index
    %67 = vector.load %arg0[%66, %c0_14, %c0_15] : memref<8x8x128xf32, #tpu.memory_space<vmem>>, vector<1x8x128xf32>
    %68 = vector.shape_cast %67 : vector<1x8x128xf32> to vector<8x128xf32>
    %cst_16 = arith.constant dense<0.000000e+00> : vector<8x128xf32>
    %69 = tpu.matmul %65, %0, %cst_16 {dimension_numbers = #tpu.dot_dimension_numbers<[1], [0], [0], [1], [0, 0, 1, 1], [], []>} : vector<8x32xf32>, vector<32x128xf32>, vector<8x128xf32> -> vector<8x128xf32>
    %70 = arith.addf %68, %69 : vector<8x128xf32>
    %71 = vector.extract_strided_slice %70 {offsets = [0, 0], sizes = [8, 96], strides = [1, 1]} : vector<8x128xf32> to vector<8x96xf32>
    %72 = arith.negf %71 : vector<8x96xf32>
    %73 = math.exp %72 : vector<8x96xf32>
    %cst_17 = arith.constant 1.000000e+00 : f32
    %74 = vector.broadcast %cst_17 : f32 to vector<8x96xf32>
    %75 = arith.addf %74, %73 : vector<8x96xf32>
    %76 = arith.divf %74, %75 : vector<8x96xf32>
    %77 = vector.extract_strided_slice %70 {offsets = [0, 96], sizes = [8, 32], strides = [1, 1]} : vector<8x128xf32> to vector<8x32xf32>
    %78 = math.tanh %77 : vector<8x32xf32>
    %79 = vector.extract_strided_slice %76 {offsets = [0, 0], sizes = [8, 32], strides = [1, 1]} : vector<8x96xf32> to vector<8x32xf32>
    %80 = vector.extract_strided_slice %76 {offsets = [0, 32], sizes = [8, 32], strides = [1, 1]} : vector<8x96xf32> to vector<8x32xf32>
    %81 = vector.extract_strided_slice %76 {offsets = [0, 64], sizes = [8, 32], strides = [1, 1]} : vector<8x96xf32> to vector<8x32xf32>
    %82 = arith.mulf %80, %63 : vector<8x32xf32>
    %83 = arith.mulf %79, %78 : vector<8x32xf32>
    %84 = arith.addf %82, %83 : vector<8x32xf32>
    %85 = math.tanh %84 : vector<8x32xf32>
    %86 = arith.mulf %81, %85 : vector<8x32xf32>
    %c4_i32 = arith.constant 4 : i32
    %87 = arith.index_cast %c4_i32 : i32 to index
    %c0_18 = arith.constant 0 : index
    %c0_19 = arith.constant 0 : index
    %88 = vector.load %arg0[%87, %c0_18, %c0_19] : memref<8x8x128xf32, #tpu.memory_space<vmem>>, vector<1x8x128xf32>
    %89 = vector.shape_cast %88 : vector<1x8x128xf32> to vector<8x128xf32>
    %cst_20 = arith.constant dense<0.000000e+00> : vector<8x128xf32>
    %90 = tpu.matmul %86, %0, %cst_20 {dimension_numbers = #tpu.dot_dimension_numbers<[1], [0], [0], [1], [0, 0, 1, 1], [], []>} : vector<8x32xf32>, vector<32x128xf32>, vector<8x128xf32> -> vector<8x128xf32>
    %91 = arith.addf %89, %90 : vector<8x128xf32>
    %92 = vector.extract_strided_slice %91 {offsets = [0, 0], sizes = [8, 96], strides = [1, 1]} : vector<8x128xf32> to vector<8x96xf32>
    %93 = arith.negf %92 : vector<8x96xf32>
    %94 = math.exp %93 : vector<8x96xf32>
    %cst_21 = arith.constant 1.000000e+00 : f32
    %95 = vector.broadcast %cst_21 : f32 to vector<8x96xf32>
    %96 = arith.addf %95, %94 : vector<8x96xf32>
    %97 = arith.divf %95, %96 : vector<8x96xf32>
    %98 = vector.extract_strided_slice %91 {offsets = [0, 96], sizes = [8, 32], strides = [1, 1]} : vector<8x128xf32> to vector<8x32xf32>
    %99 = math.tanh %98 : vector<8x32xf32>
    %100 = vector.extract_strided_slice %97 {offsets = [0, 0], sizes = [8, 32], strides = [1, 1]} : vector<8x96xf32> to vector<8x32xf32>
    %101 = vector.extract_strided_slice %97 {offsets = [0, 32], sizes = [8, 32], strides = [1, 1]} : vector<8x96xf32> to vector<8x32xf32>
    %102 = vector.extract_strided_slice %97 {offsets = [0, 64], sizes = [8, 32], strides = [1, 1]} : vector<8x96xf32> to vector<8x32xf32>
    %103 = arith.mulf %101, %84 : vector<8x32xf32>
    %104 = arith.mulf %100, %99 : vector<8x32xf32>
    %105 = arith.addf %103, %104 : vector<8x32xf32>
    %106 = math.tanh %105 : vector<8x32xf32>
    %107 = arith.mulf %102, %106 : vector<8x32xf32>
    %c5_i32 = arith.constant 5 : i32
    %108 = arith.index_cast %c5_i32 : i32 to index
    %c0_22 = arith.constant 0 : index
    %c0_23 = arith.constant 0 : index
    %109 = vector.load %arg0[%108, %c0_22, %c0_23] : memref<8x8x128xf32, #tpu.memory_space<vmem>>, vector<1x8x128xf32>
    %110 = vector.shape_cast %109 : vector<1x8x128xf32> to vector<8x128xf32>
    %cst_24 = arith.constant dense<0.000000e+00> : vector<8x128xf32>
    %111 = tpu.matmul %107, %0, %cst_24 {dimension_numbers = #tpu.dot_dimension_numbers<[1], [0], [0], [1], [0, 0, 1, 1], [], []>} : vector<8x32xf32>, vector<32x128xf32>, vector<8x128xf32> -> vector<8x128xf32>
    %112 = arith.addf %110, %111 : vector<8x128xf32>
    %113 = vector.extract_strided_slice %112 {offsets = [0, 0], sizes = [8, 96], strides = [1, 1]} : vector<8x128xf32> to vector<8x96xf32>
    %114 = arith.negf %113 : vector<8x96xf32>
    %115 = math.exp %114 : vector<8x96xf32>
    %cst_25 = arith.constant 1.000000e+00 : f32
    %116 = vector.broadcast %cst_25 : f32 to vector<8x96xf32>
    %117 = arith.addf %116, %115 : vector<8x96xf32>
    %118 = arith.divf %116, %117 : vector<8x96xf32>
    %119 = vector.extract_strided_slice %112 {offsets = [0, 96], sizes = [8, 32], strides = [1, 1]} : vector<8x128xf32> to vector<8x32xf32>
    %120 = math.tanh %119 : vector<8x32xf32>
    %121 = vector.extract_strided_slice %118 {offsets = [0, 0], sizes = [8, 32], strides = [1, 1]} : vector<8x96xf32> to vector<8x32xf32>
    %122 = vector.extract_strided_slice %118 {offsets = [0, 32], sizes = [8, 32], strides = [1, 1]} : vector<8x96xf32> to vector<8x32xf32>
    %123 = vector.extract_strided_slice %118 {offsets = [0, 64], sizes = [8, 32], strides = [1, 1]} : vector<8x96xf32> to vector<8x32xf32>
    %124 = arith.mulf %122, %105 : vector<8x32xf32>
    %125 = arith.mulf %121, %120 : vector<8x32xf32>
    %126 = arith.addf %124, %125 : vector<8x32xf32>
    %127 = math.tanh %126 : vector<8x32xf32>
    %128 = arith.mulf %123, %127 : vector<8x32xf32>
    %c6_i32 = arith.constant 6 : i32
    %129 = arith.index_cast %c6_i32 : i32 to index
    %c0_26 = arith.constant 0 : index
    %c0_27 = arith.constant 0 : index
    %130 = vector.load %arg0[%129, %c0_26, %c0_27] : memref<8x8x128xf32, #tpu.memory_space<vmem>>, vector<1x8x128xf32>
    %131 = vector.shape_cast %130 : vector<1x8x128xf32> to vector<8x128xf32>
    %cst_28 = arith.constant dense<0.000000e+00> : vector<8x128xf32>
    %132 = tpu.matmul %128, %0, %cst_28 {dimension_numbers = #tpu.dot_dimension_numbers<[1], [0], [0], [1], [0, 0, 1, 1], [], []>} : vector<8x32xf32>, vector<32x128xf32>, vector<8x128xf32> -> vector<8x128xf32>
    %133 = arith.addf %131, %132 : vector<8x128xf32>
    %134 = vector.extract_strided_slice %133 {offsets = [0, 0], sizes = [8, 96], strides = [1, 1]} : vector<8x128xf32> to vector<8x96xf32>
    %135 = arith.negf %134 : vector<8x96xf32>
    %136 = math.exp %135 : vector<8x96xf32>
    %cst_29 = arith.constant 1.000000e+00 : f32
    %137 = vector.broadcast %cst_29 : f32 to vector<8x96xf32>
    %138 = arith.addf %137, %136 : vector<8x96xf32>
    %139 = arith.divf %137, %138 : vector<8x96xf32>
    %140 = vector.extract_strided_slice %133 {offsets = [0, 96], sizes = [8, 32], strides = [1, 1]} : vector<8x128xf32> to vector<8x32xf32>
    %141 = math.tanh %140 : vector<8x32xf32>
    %142 = vector.extract_strided_slice %139 {offsets = [0, 0], sizes = [8, 32], strides = [1, 1]} : vector<8x96xf32> to vector<8x32xf32>
    %143 = vector.extract_strided_slice %139 {offsets = [0, 32], sizes = [8, 32], strides = [1, 1]} : vector<8x96xf32> to vector<8x32xf32>
    %144 = vector.extract_strided_slice %139 {offsets = [0, 64], sizes = [8, 32], strides = [1, 1]} : vector<8x96xf32> to vector<8x32xf32>
    %145 = arith.mulf %143, %126 : vector<8x32xf32>
    %146 = arith.mulf %142, %141 : vector<8x32xf32>
    %147 = arith.addf %145, %146 : vector<8x32xf32>
    %148 = math.tanh %147 : vector<8x32xf32>
    %149 = arith.mulf %144, %148 : vector<8x32xf32>
    %c7_i32 = arith.constant 7 : i32
    %150 = arith.index_cast %c7_i32 : i32 to index
    %c0_30 = arith.constant 0 : index
    %c0_31 = arith.constant 0 : index
    %151 = vector.load %arg0[%150, %c0_30, %c0_31] : memref<8x8x128xf32, #tpu.memory_space<vmem>>, vector<1x8x128xf32>
    %152 = vector.shape_cast %151 : vector<1x8x128xf32> to vector<8x128xf32>
    %cst_32 = arith.constant dense<0.000000e+00> : vector<8x128xf32>
    %153 = tpu.matmul %149, %0, %cst_32 {dimension_numbers = #tpu.dot_dimension_numbers<[1], [0], [0], [1], [0, 0, 1, 1], [], []>} : vector<8x32xf32>, vector<32x128xf32>, vector<8x128xf32> -> vector<8x128xf32>
    %154 = arith.addf %152, %153 : vector<8x128xf32>
    %155 = vector.extract_strided_slice %154 {offsets = [0, 0], sizes = [8, 96], strides = [1, 1]} : vector<8x128xf32> to vector<8x96xf32>
    %156 = arith.negf %155 : vector<8x96xf32>
    %157 = math.exp %156 : vector<8x96xf32>
    %cst_33 = arith.constant 1.000000e+00 : f32
    %158 = vector.broadcast %cst_33 : f32 to vector<8x96xf32>
    %159 = arith.addf %158, %157 : vector<8x96xf32>
    %160 = arith.divf %158, %159 : vector<8x96xf32>
    %161 = vector.extract_strided_slice %154 {offsets = [0, 96], sizes = [8, 32], strides = [1, 1]} : vector<8x128xf32> to vector<8x32xf32>
    %162 = math.tanh %161 : vector<8x32xf32>
    %163 = vector.extract_strided_slice %160 {offsets = [0, 0], sizes = [8, 32], strides = [1, 1]} : vector<8x96xf32> to vector<8x32xf32>
    %164 = vector.extract_strided_slice %160 {offsets = [0, 32], sizes = [8, 32], strides = [1, 1]} : vector<8x96xf32> to vector<8x32xf32>
    %165 = vector.extract_strided_slice %160 {offsets = [0, 64], sizes = [8, 32], strides = [1, 1]} : vector<8x96xf32> to vector<8x32xf32>
    %166 = arith.mulf %164, %147 : vector<8x32xf32>
    %167 = arith.mulf %163, %162 : vector<8x32xf32>
    %168 = arith.addf %166, %167 : vector<8x32xf32>
    %169 = math.tanh %168 : vector<8x32xf32>
    %170 = arith.mulf %165, %169 : vector<8x32xf32>
    %c8_i32 = arith.constant 8 : i32
    %c0_34 = arith.constant 0 : index
    %c0_35 = arith.constant 0 : index
    %171 = vector.load %arg2[%c0_34, %c0_35] : memref<8x32xf32, #tpu.memory_space<vmem>>, vector<8x32xf32>
    tpu.vector_store %arg2[%c0_34, %c0_35], %170 {strides = array<i32>} : memref<8x32xf32, #tpu.memory_space<vmem>>, vector<8x32xf32>,
    return
  }
}

</mosaic_0001>

<bundles_post_ra>
// kernel: tpu_custom_call.1
= control target key start
LH: loop header
LB: loop body
LE: loop exit
PB: predicated region body
PF: predicated region fallthrough
CT: control target
= control target key end

     0   :  { %7 = vsyncpa [#allocation3], 0  ;;  %s826_s0 = inlined_call_operand.hbm [shape: f32[8,8,128], index: 0, kind: input, shape index: {}]   ;;  %s827_s1 = inlined_call_operand.hbm [shape: f32[32,128], index: 1, kind: input, shape index: {}]   ;;  %s828_s2 = inlined_call_operand.hbm [shape: f32[8,32], index: 2, kind: output, shape index: {}]  }
   0x1   :  { %8 = vsyncpa [#allocation6], 0 }
   0x2   :  { %9 = vsyncpa [#allocation4], 0  ;;  %s14_s11 = sshll.u32 %s826_s0, 4  ;;  %s754_s12 = smov [#allocation2]   ;;  %s15_s11 = int_to_ptr.hbm [resolvable:$true] %s14_s11 }
   0x3   :  { %s16_s13 = sshll.u32 %s754_s12, 4  ;;  %s27_s16 = sshll.u32 %s827_s1, 4  ;;  %s17_s13 = int_to_ptr.vmem [resolvable:$true] %s16_s13  ;;  %s28_s16 = int_to_ptr.hbm [resolvable:$true] %s27_s16 }
   0x4   :  { %s755_s17 = smov 128   ;;  %s756_s18 = smov 8  }
   0x5   :  { %22 = dma.hbm_to_vmem [thread:$0]  %s15_s11, 1024, %s17_s13, [#allocation3], %s755_s17, %s755_s17, %s756_s18  }
   0x6   :  { %s757_s19 = smov [#allocation5]  }
   0x7   :  { %s29_s20 = sshll.u32 %s757_s19, 4  ;;  %s30_s20 = int_to_ptr.vmem [resolvable:$true] %s29_s20 }
   0x8   :  { %35 = dma.hbm_to_vmem [thread:$0]  %s28_s16, 512, %s30_s20, [#allocation6], %s755_s17, %s755_s17, %s756_s18  }
   0x9   :  { %748 = dma.done.wait [#allocation3], 1024  }
   0xa   :  { %749 = vsyncadd [#allocation3], 4294966272 }
   0xb   :  { %750 = dma.done.wait [#allocation6], 512  }
   0xc   :  { %751 = vsyncadd [#allocation6], 4294966784  ;;  %v47_v0 = vld [vmem:[#allocation5 + $0x18] sm:$0xff]  ;;  %v46_v1 = vld [vmem:[#allocation5 + $0x10] sm:$0xff]  ;;  %v758_v4 = vmov 0.0   ;;  %s759_s0 = smov 32  }
   0xd   :  { %65 = vmatpush.msra.mxu0 %v47_v0  ;;  %130 = vmatpush.msra.mxu1 %v47_v0  ;;  %v45_v2 = vld [vmem:[#allocation5 + $0x8] sm:$0xff]  ;;  %v44_v3 = vld [vmem:[#allocation5] sm:$0xff]  ;;  %s760_s1 = smov 64   ;;  %vm49_vm4 = vcmask 261120   ;;  %v177_v57 = vld [vmem:[#allocation2 + $0x10] sm:$0xff]  ;;  %s761_s21 = smov [#allocation7]  }
   0xe   :  { %195 = vmatpush.msra.mxu2 %v47_v0  ;;  %260 = vmatpush.msra.mxu3 %v47_v0  ;;  %v48_v5 = vld [vmem:[#allocation2] sm:$0xff]  ;;  %v112_v31 = vld [vmem:[#allocation2 + $0x8] sm:$0xff]  ;;  %s576_s22 = sshll.u32 %s761_s21, 4  ;;  %s578_s25 = sshll.u32 %s828_s2, 4  ;;  %s577_s22 = int_to_ptr.vmem [resolvable:$true] %s576_s22  ;;  %s579_s25 = int_to_ptr.hbm [resolvable:$true] %s578_s25 }
   0xf   :  { %66 = vmatpush.msra.mxu0 %v46_v1  ;;  %131 = vmatpush.msra.mxu1 %v46_v1 }
  0x10   :  { %196 = vmatpush.msra.mxu2 %v46_v1  ;;  %261 = vmatpush.msra.mxu3 %v46_v1 }
  0x11   :  { %67 = vmatpush.msra.mxu0 %v45_v2  ;;  %132 = vmatpush.msra.mxu1 %v45_v2 }
  0x12   :  { %197 = vmatpush.msra.mxu2 %v45_v2  ;;  %262 = vmatpush.msra.mxu3 %v45_v2 }
  0x13   :  { %68 = vmatpush.msra.mxu0 %v44_v3  ;;  %133 = vmatpush.msra.mxu1 %v44_v3 }
  0x14   :  { %69 = vmatmul.f32.vlgmr.msra.gmra.mxu0 %v758_v4  ;;  %198 = vmatpush.msra.mxu2 %v44_v3 }
  0x15   :  { %263 = vmatpush.msra.mxu3 %v44_v3  ;;  %325 = vmatpush.msrb.mxu0 %v47_v0 }
  0x16   :  { %390 = vmatpush.msrb.mxu1 %v47_v0  ;;  %455 = vmatpush.msrb.mxu2 %v47_v0 }
  0x17   :  { %326 = vmatpush.msrb.mxu0 %v46_v1  ;;  %520 = vmatpush.msrb.mxu3 %v47_v0 }
  0x18   :  { %391 = vmatpush.msrb.mxu1 %v46_v1  ;;  %456 = vmatpush.msrb.mxu2 %v46_v1 }
  0x19   :  { %327 = vmatpush.msrb.mxu0 %v45_v2  ;;  %521 = vmatpush.msrb.mxu3 %v46_v1 }
  0x1a   :  { %392 = vmatpush.msrb.mxu1 %v45_v2  ;;  %457 = vmatpush.msrb.mxu2 %v45_v2 }
  0x1b   :  { %328 = vmatpush.msrb.mxu0 %v44_v3  ;;  %522 = vmatpush.msrb.mxu3 %v45_v2 }
  0x1c   :  { %393 = vmatpush.msrb.mxu1 %v44_v3  ;;  %458 = vmatpush.msrb.mxu2 %v44_v3 }
  0x1d   :  { %523 = vmatpush.msrb.mxu3 %v44_v3 }
  0x91   :  { %v70_v6 = vpop.f32.mrf.mxu0 }
  0x92   :  { %v73_v7 = vadd.f32 %v70_v6, %v48_v5 }
  0x94   :  { %612 = vtanh.f32 %v73_v7  ;;  %v589_v9 = vmul.f32 -1.442695, %v73_v7 }
  0x96   :  { %614 = vpow2.f32 %v589_v9 }
  0x9a   :  { %v613_v8 = vpop.eup %612 }
  0x9b   :  { %96 = vrot.lane.b32.xlu0 %v613_v8, %s759_s0 }
  0x9c   :  { %v615_v10 = vpop.eup %614 }
  0x9d   :  { %v77_v11 = vadd.f32 1.0, %v615_v10 }
  0x9f   :  { %616 = vrcp.f32 %v77_v11  ;;  %v89_v17 = vand.u32 2147483648, %v77_v11  ;;  %vm83_vm1 = vweird.f32 %v77_v11  ;;  %v87_v18 = vand.u32 2147483647, %v77_v11 }
  0xa1   :  { %v90_v20 = vor.u32 1.1754944e-38, %v89_v17  ;;  %vm88_vm3 = vcmp.eq.f32.partialorder %v87_v18, 8.507059e+37 }
  0xa5   :  { %v617_v12 = vpop.eup %616 }
  0xa6   :  { %v79_v13 = vmul.f32 %v617_v12, %v77_v11  ;;  %vm84_vm0 = vweird.f32 %v617_v12 }
  0xa7   :  { %vm85_vm2 = vmor %vm83_vm1, %vm84_vm0 }
  0xa8   :  { %v80_v14 = vsub.f32 1.0, %v79_v13 }
  0xaa   :  { %v81_v15 = vmul.f32 %v617_v12, %v80_v14 }
  0xac   :  { %v82_v16 = vadd.f32 %v617_v12, %v81_v15 }
  0xae   :  { %v86_v19 = vsel %vm85_vm2, %v617_v12, %v82_v16 }
  0xaf   :  { %v91_v22 = vsel %vm88_vm3, %v90_v20, %v86_v19  ;;  %v242_v19 = vld [vmem:[#allocation2 + $0x18] sm:$0xff] }
  0xb0   :  { %v94_v24 = vmul.f32 0.0, %v91_v22 }
 0x10d   :  { %v97_v21 = vpop.permute.xlu0 %96 }
 0x10e   :  { %v99_v23 = vmul.f32 %v97_v21, %v91_v22 }
 0x110   :  { %101 = vrot.lane.b32.xlu0 %v99_v23, %s759_s0 }
 0x182   :  { %v102_v25 = vpop.permute.xlu0 %101 }
 0x183   :  { %v104_v26 = vadd.f32 %v102_v25, %v94_v24 }
 0x185   :  { %618 = vtanh.f32 %v104_v26 }
 0x18b   :  { %v619_v27 = vpop.eup %618 }
 0x18c   :  { %107 = vrot.lane.b32.xlu1 %v619_v27, %s759_s0 }
 0x1fe   :  { %v108_v28 = vpop.permute.xlu1 %107 }
 0x1ff   :  { %v110_v29 = vmul.f32 %v108_v28, %v91_v22 }
 0x201   :  { %114 = vrot.lane.b32.xlu1 %v110_v29, %s760_s1 }
 0x273   :  { %v115_v30 = vpop.permute.xlu1 %114 }
 0x274   :  { %590 = vmatmul.msk.f32.vlgmr.msra.gmra.mxu1 %vm49_vm4, %v115_v30 }
 0x2f1   :  { %v135_v32 = vpop.f32.mrf.mxu1 }
 0x2f2   :  { %v138_v33 = vadd.f32 %v135_v32, %v112_v31 }
 0x2f4   :  { %620 = vtanh.f32 %v138_v33  ;;  %v591_v35 = vmul.f32 -1.442695, %v138_v33 }
 0x2f6   :  { %622 = vpow2.f32 %v591_v35 }
 0x2fa   :  { %v621_v34 = vpop.eup %620 }
 0x2fb   :  { %161 = vrot.lane.b32.xlu2 %v621_v34, %s759_s0 }
 0x2fc   :  { %v623_v36 = vpop.eup %622 }
 0x2fd   :  { %v142_v37 = vadd.f32 1.0, %v623_v36 }
 0x2ff   :  { %624 = vrcp.f32 %v142_v37  ;;  %v154_v43 = vand.u32 2147483648, %v142_v37  ;;  %vm148_vm6 = vweird.f32 %v142_v37  ;;  %v152_v44 = vand.u32 2147483647, %v142_v37 }
 0x301   :  { %v155_v46 = vor.u32 1.1754944e-38, %v154_v43  ;;  %vm153_vm8 = vcmp.eq.f32.partialorder %v152_v44, 8.507059e+37 }
 0x305   :  { %v625_v38 = vpop.eup %624 }
 0x306   :  { %v144_v39 = vmul.f32 %v625_v38, %v142_v37  ;;  %vm149_vm5 = vweird.f32 %v625_v38 }
 0x307   :  { %vm150_vm7 = vmor %vm148_vm6, %vm149_vm5 }
 0x308   :  { %v145_v40 = vsub.f32 1.0, %v144_v39 }
 0x30a   :  { %v146_v41 = vmul.f32 %v625_v38, %v145_v40 }
 0x30c   :  { %v147_v42 = vadd.f32 %v625_v38, %v146_v41 }
 0x30e   :  { %v151_v45 = vsel %vm150_vm7, %v625_v38, %v147_v42 }
 0x30f   :  { %v156_v48 = vsel %vm153_vm8, %v155_v46, %v151_v45  ;;  %v307_v45 = vld [vmem:[#allocation2 + $0x20] sm:$0xff] }
 0x310   :  { %v159_v50 = vmul.f32 %v156_v48, %v104_v26 }
 0x355   :  { %v162_v47 = vpop.permute.xlu2 %161 }
 0x356   :  { %v164_v49 = vmul.f32 %v162_v47, %v156_v48 }
 0x358   :  { %166 = vrot.lane.b32.xlu2 %v164_v49, %s759_s0 }
 0x3b2   :  { %v167_v51 = vpop.permute.xlu2 %166 }
 0x3b3   :  { %v169_v52 = vadd.f32 %v167_v51, %v159_v50 }
 0x3b5   :  { %626 = vtanh.f32 %v169_v52 }
 0x3bb   :  { %v627_v53 = vpop.eup %626 }
 0x3bc   :  { %172 = vrot.lane.b32.xlu0 %v627_v53, %s759_s0 }
 0x42e   :  { %v173_v54 = vpop.permute.xlu0 %172 }
 0x42f   :  { %v175_v55 = vmul.f32 %v173_v54, %v156_v48 }
 0x431   :  { %179 = vrot.lane.b32.xlu1 %v175_v55, %s760_s1 }
 0x4a3   :  { %v180_v56 = vpop.permute.xlu1 %179 }
 0x4a4   :  { %592 = vmatmul.msk.f32.vlgmr.msra.gmra.mxu2 %vm49_vm4, %v180_v56 }
 0x527   :  { %v200_v58 = vpop.f32.mrf.mxu2 }
 0x528   :  { %v203_v59 = vadd.f32 %v200_v58, %v177_v57 }
 0x52a   :  { %628 = vtanh.f32 %v203_v59  ;;  %v593_v61 = vmul.f32 -1.442695, %v203_v59 }
 0x52c   :  { %630 = vpow2.f32 %v593_v61 }
 0x530   :  { %v629_v60 = vpop.eup %628 }
 0x531   :  { %226 = vrot.lane.b32.xlu2 %v629_v60, %s759_s0 }
 0x532   :  { %v631_v62 = vpop.eup %630 }
 0x533   :  { %v207_v63 = vadd.f32 1.0, %v631_v62 }
 0x535   :  { %632 = vrcp.f32 %v207_v63  ;;  %v219_v5 = vand.u32 2147483648, %v207_v63  ;;  %vm213_vm10 = vweird.f32 %v207_v63  ;;  %v217_v6 = vand.u32 2147483647, %v207_v63 }
 0x537   :  { %v220_v8 = vor.u32 1.1754944e-38, %v219_v5  ;;  %vm218_vm12 = vcmp.eq.f32.partialorder %v217_v6, 8.507059e+37 }
 0x53b   :  { %v633_v0 = vpop.eup %632 }
 0x53c   :  { %v209_v1 = vmul.f32 %v633_v0, %v207_v63  ;;  %vm214_vm9 = vweird.f32 %v633_v0 }
 0x53d   :  { %vm215_vm11 = vmor %vm213_vm10, %vm214_vm9 }
 0x53e   :  { %v210_v2 = vsub.f32 1.0, %v209_v1 }
 0x540   :  { %v211_v3 = vmul.f32 %v633_v0, %v210_v2 }
 0x542   :  { %v212_v4 = vadd.f32 %v633_v0, %v211_v3 }
 0x544   :  { %v216_v7 = vsel %vm215_vm11, %v633_v0, %v212_v4 }
 0x545   :  { %v221_v10 = vsel %vm218_vm12, %v220_v8, %v216_v7  ;;  %v372_v7 = vld [vmem:[#allocation2 + $0x28] sm:$0xff] }
 0x546   :  { %v224_v12 = vmul.f32 %v221_v10, %v169_v52 }
 0x58b   :  { %v227_v9 = vpop.permute.xlu2 %226 }
 0x58c   :  { %v229_v11 = vmul.f32 %v227_v9, %v221_v10 }
 0x58e   :  { %231 = vrot.lane.b32.xlu0 %v229_v11, %s759_s0 }
 0x600   :  { %v232_v13 = vpop.permute.xlu0 %231 }
 0x601   :  { %v234_v14 = vadd.f32 %v232_v13, %v224_v12 }
 0x603   :  { %634 = vtanh.f32 %v234_v14 }
 0x609   :  { %v635_v15 = vpop.eup %634 }
 0x60a   :  { %237 = vrot.lane.b32.xlu1 %v635_v15, %s759_s0 }
 0x67c   :  { %v238_v16 = vpop.permute.xlu1 %237 }
 0x67d   :  { %v240_v17 = vmul.f32 %v238_v16, %v221_v10 }
 0x67f   :  { %244 = vrot.lane.b32.xlu2 %v240_v17, %s760_s1 }
 0x6d9   :  { %v245_v18 = vpop.permute.xlu2 %244 }
 0x6da   :  { %594 = vmatmul.msk.f32.vlgmr.msra.gmra.mxu3 %vm49_vm4, %v245_v18 }
 0x75d   :  { %v265_v20 = vpop.f32.mrf.mxu3 }
 0x75e   :  { %v268_v21 = vadd.f32 %v265_v20, %v242_v19 }
 0x760   :  { %636 = vtanh.f32 %v268_v21  ;;  %v595_v23 = vmul.f32 -1.442695, %v268_v21 }
 0x762   :  { %638 = vpow2.f32 %v595_v23 }
 0x766   :  { %v637_v22 = vpop.eup %636 }
 0x767   :  { %291 = vrot.lane.b32.xlu0 %v637_v22, %s759_s0 }
 0x768   :  { %v639_v24 = vpop.eup %638 }
 0x769   :  { %v272_v25 = vadd.f32 1.0, %v639_v24 }
 0x76b   :  { %640 = vrcp.f32 %v272_v25  ;;  %v284_v31 = vand.u32 2147483648, %v272_v25  ;;  %vm278_vm14 = vweird.f32 %v272_v25  ;;  %v282_v32 = vand.u32 2147483647, %v272_v25 }
 0x76d   :  { %v285_v34 = vor.u32 1.1754944e-38, %v284_v31  ;;  %vm283_vm0 = vcmp.eq.f32.partialorder %v282_v32, 8.507059e+37 }
 0x771   :  { %v641_v26 = vpop.eup %640 }
 0x772   :  { %v274_v27 = vmul.f32 %v641_v26, %v272_v25  ;;  %vm279_vm13 = vweird.f32 %v641_v26 }
 0x773   :  { %vm280_vm15 = vmor %vm278_vm14, %vm279_vm13 }
 0x774   :  { %v275_v28 = vsub.f32 1.0, %v274_v27 }
 0x776   :  { %v276_v29 = vmul.f32 %v641_v26, %v275_v28 }
 0x778   :  { %v277_v30 = vadd.f32 %v641_v26, %v276_v29 }
 0x77a   :  { %v281_v33 = vsel %vm280_vm15, %v641_v26, %v277_v30 }
 0x77b   :  { %v286_v36 = vsel %vm283_vm0, %v285_v34, %v281_v33  ;;  %v437_v33 = vld [vmem:[#allocation2 + $0x30] sm:$0xff] }
 0x77c   :  { %v289_v38 = vmul.f32 %v286_v36, %v234_v14 }
 0x7d9   :  { %v292_v35 = vpop.permute.xlu0 %291 }
 0x7da   :  { %v294_v37 = vmul.f32 %v292_v35, %v286_v36 }
 0x7dc   :  { %296 = vrot.lane.b32.xlu1 %v294_v37, %s759_s0 }
 0x84e   :  { %v297_v39 = vpop.permute.xlu1 %296 }
 0x84f   :  { %v299_v40 = vadd.f32 %v297_v39, %v289_v38 }
 0x851   :  { %642 = vtanh.f32 %v299_v40 }
 0x857   :  { %v643_v41 = vpop.eup %642 }
 0x858   :  { %302 = vrot.lane.b32.xlu2 %v643_v41, %s759_s0 }
 0x8b2   :  { %v303_v42 = vpop.permute.xlu2 %302 }
 0x8b3   :  { %v305_v43 = vmul.f32 %v303_v42, %v286_v36 }
 0x8b5   :  { %309 = vrot.lane.b32.xlu0 %v305_v43, %s760_s1 }
 0x927   :  { %v310_v44 = vpop.permute.xlu0 %309 }
 0x928   :  { %596 = vmatmul.msk.f32.vlgmr.msrb.gmra.mxu0 %vm49_vm4, %v310_v44 }
 0x9a5   :  { %v330_v46 = vpop.f32.mrf.mxu0 }
 0x9a6   :  { %v333_v47 = vadd.f32 %v330_v46, %v307_v45 }
 0x9a8   :  { %644 = vtanh.f32 %v333_v47  ;;  %v597_v49 = vmul.f32 -1.442695, %v333_v47 }
 0x9aa   :  { %646 = vpow2.f32 %v597_v49 }
 0x9ae   :  { %v645_v48 = vpop.eup %644 }
 0x9af   :  { %356 = vrot.lane.b32.xlu1 %v645_v48, %s759_s0 }
 0x9b0   :  { %v647_v50 = vpop.eup %646 }
 0x9b1   :  { %v337_v51 = vadd.f32 1.0, %v647_v50 }
 0x9b3   :  { %648 = vrcp.f32 %v337_v51  ;;  %v349_v57 = vand.u32 2147483648, %v337_v51  ;;  %vm343_vm2 = vweird.f32 %v337_v51  ;;  %v347_v58 = vand.u32 2147483647, %v337_v51 }
 0x9b5   :  { %v350_v60 = vor.u32 1.1754944e-38, %v349_v57  ;;  %vm348_vm5 = vcmp.eq.f32.partialorder %v347_v58, 8.507059e+37 }
 0x9b9   :  { %v649_v52 = vpop.eup %648 }
 0x9ba   :  { %v339_v53 = vmul.f32 %v649_v52, %v337_v51  ;;  %vm344_vm1 = vweird.f32 %v649_v52 }
 0x9bb   :  { %vm345_vm3 = vmor %vm343_vm2, %vm344_vm1 }
 0x9bc   :  { %v340_v54 = vsub.f32 1.0, %v339_v53 }
 0x9be   :  { %v341_v55 = vmul.f32 %v649_v52, %v340_v54 }
 0x9c0   :  { %v342_v56 = vadd.f32 %v649_v52, %v341_v55 }
 0x9c2   :  { %v346_v59 = vsel %vm345_vm3, %v649_v52, %v342_v56 }
 0x9c3   :  { %v351_v62 = vsel %vm348_vm5, %v350_v60, %v346_v59  ;;  %v502_v59 = vld [vmem:[#allocation2 + $0x38] sm:$0xff] }
 0x9c4   :  { %v354_v0 = vmul.f32 %v351_v62, %v299_v40 }
 0xa21   :  { %v357_v61 = vpop.permute.xlu1 %356 }
 0xa22   :  { %v359_v63 = vmul.f32 %v357_v61, %v351_v62 }
 0xa24   :  { %361 = vrot.lane.b32.xlu2 %v359_v63, %s759_s0 }
 0xa7e   :  { %v362_v1 = vpop.permute.xlu2 %361 }
 0xa7f   :  { %v364_v2 = vadd.f32 %v362_v1, %v354_v0 }
 0xa81   :  { %650 = vtanh.f32 %v364_v2 }
 0xa87   :  { %v651_v3 = vpop.eup %650 }
 0xa88   :  { %367 = vrot.lane.b32.xlu0 %v651_v3, %s759_s0 }
 0xafa   :  { %v368_v4 = vpop.permute.xlu0 %367 }
 0xafb   :  { %v370_v5 = vmul.f32 %v368_v4, %v351_v62 }
 0xafd   :  { %374 = vrot.lane.b32.xlu1 %v370_v5, %s760_s1 }
 0xb6f   :  { %v375_v6 = vpop.permute.xlu1 %374 }
 0xb70   :  { %598 = vmatmul.msk.f32.vlgmr.msrb.gmra.mxu1 %vm49_vm4, %v375_v6 }
 0xbed   :  { %v395_v8 = vpop.f32.mrf.mxu1 }
 0xbee   :  { %v398_v9 = vadd.f32 %v395_v8, %v372_v7 }
 0xbf0   :  { %652 = vtanh.f32 %v398_v9  ;;  %v599_v11 = vmul.f32 -1.442695, %v398_v9 }
 0xbf2   :  { %654 = vpow2.f32 %v599_v11 }
 0xbf6   :  { %v653_v10 = vpop.eup %652 }
 0xbf7   :  { %421 = vrot.lane.b32.xlu2 %v653_v10, %s759_s0 }
 0xbf8   :  { %v655_v12 = vpop.eup %654 }
 0xbf9   :  { %v402_v13 = vadd.f32 1.0, %v655_v12 }
 0xbfb   :  { %656 = vrcp.f32 %v402_v13  ;;  %v414_v19 = vand.u32 2147483648, %v402_v13  ;;  %vm408_vm7 = vweird.f32 %v402_v13  ;;  %v412_v20 = vand.u32 2147483647, %v402_v13 }
 0xbfd   :  { %v415_v22 = vor.u32 1.1754944e-38, %v414_v19  ;;  %vm413_vm9 = vcmp.eq.f32.partialorder %v412_v20, 8.507059e+37 }
 0xc01   :  { %v657_v14 = vpop.eup %656 }
 0xc02   :  { %v404_v15 = vmul.f32 %v657_v14, %v402_v13  ;;  %vm409_vm6 = vweird.f32 %v657_v14 }
 0xc03   :  { %vm410_vm8 = vmor %vm408_vm7, %vm409_vm6 }
 0xc04   :  { %v405_v16 = vsub.f32 1.0, %v404_v15 }
 0xc06   :  { %v406_v17 = vmul.f32 %v657_v14, %v405_v16 }
 0xc08   :  { %v407_v18 = vadd.f32 %v657_v14, %v406_v17 }
 0xc0a   :  { %v411_v21 = vsel %vm410_vm8, %v657_v14, %v407_v18 }
 0xc0b   :  { %v416_v24 = vsel %vm413_vm9, %v415_v22, %v411_v21 }
 0xc0c   :  { %v419_v26 = vmul.f32 %v416_v24, %v364_v2 }
 0xc51   :  { %v422_v23 = vpop.permute.xlu2 %421 }
 0xc52   :  { %v424_v25 = vmul.f32 %v422_v23, %v416_v24 }
 0xc54   :  { %426 = vrot.lane.b32.xlu0 %v424_v25, %s759_s0 }
 0xcc6   :  { %v427_v27 = vpop.permute.xlu0 %426 }
 0xcc7   :  { %v429_v28 = vadd.f32 %v427_v27, %v419_v26 }
 0xcc9   :  { %658 = vtanh.f32 %v429_v28 }
 0xccf   :  { %v659_v29 = vpop.eup %658 }
 0xcd0   :  { %432 = vrot.lane.b32.xlu1 %v659_v29, %s759_s0 }
 0xd42   :  { %v433_v30 = vpop.permute.xlu1 %432 }
 0xd43   :  { %v435_v31 = vmul.f32 %v433_v30, %v416_v24 }
 0xd45   :  { %439 = vrot.lane.b32.xlu2 %v435_v31, %s760_s1 }
 0xd9f   :  { %v440_v32 = vpop.permute.xlu2 %439 }
 0xda0   :  { %600 = vmatmul.msk.f32.vlgmr.msrb.gmra.mxu2 %vm49_vm4, %v440_v32 }
 0xe23   :  { %v460_v34 = vpop.f32.mrf.mxu2 }
 0xe24   :  { %v463_v35 = vadd.f32 %v460_v34, %v437_v33 }
 0xe26   :  { %660 = vtanh.f32 %v463_v35  ;;  %v601_v37 = vmul.f32 -1.442695, %v463_v35 }
 0xe28   :  { %662 = vpow2.f32 %v601_v37 }
 0xe2c   :  { %v661_v36 = vpop.eup %660 }
 0xe2d   :  { %486 = vrot.lane.b32.xlu0 %v661_v36, %s759_s0 }
 0xe2e   :  { %v663_v38 = vpop.eup %662 }
 0xe2f   :  { %v467_v39 = vadd.f32 1.0, %v663_v38 }
 0xe31   :  { %664 = vrcp.f32 %v467_v39  ;;  %v479_v45 = vand.u32 2147483648, %v467_v39  ;;  %vm473_vm11 = vweird.f32 %v467_v39  ;;  %v477_v46 = vand.u32 2147483647, %v467_v39 }
 0xe33   :  { %v480_v48 = vor.u32 1.1754944e-38, %v479_v45  ;;  %vm478_vm13 = vcmp.eq.f32.partialorder %v477_v46, 8.507059e+37 }
 0xe37   :  { %v665_v40 = vpop.eup %664 }
 0xe38   :  { %v469_v41 = vmul.f32 %v665_v40, %v467_v39  ;;  %vm474_vm10 = vweird.f32 %v665_v40 }
 0xe39   :  { %vm475_vm12 = vmor %vm473_vm11, %vm474_vm10 }
 0xe3a   :  { %v470_v42 = vsub.f32 1.0, %v469_v41 }
 0xe3c   :  { %v471_v43 = vmul.f32 %v665_v40, %v470_v42 }
 0xe3e   :  { %v472_v44 = vadd.f32 %v665_v40, %v471_v43 }
 0xe40   :  { %v476_v47 = vsel %vm475_vm12, %v665_v40, %v472_v44 }
 0xe41   :  { %v481_v50 = vsel %vm478_vm13, %v480_v48, %v476_v47 }
 0xe42   :  { %v484_v52 = vmul.f32 %v481_v50, %v429_v28 }
 0xe9f   :  { %v487_v49 = vpop.permute.xlu0 %486 }
 0xea0   :  { %v489_v51 = vmul.f32 %v487_v49, %v481_v50 }
 0xea2   :  { %491 = vrot.lane.b32.xlu1 %v489_v51, %s759_s0 }
 0xf14   :  { %v492_v53 = vpop.permute.xlu1 %491 }
 0xf15   :  { %v494_v54 = vadd.f32 %v492_v53, %v484_v52 }
 0xf17   :  { %666 = vtanh.f32 %v494_v54 }
 0xf1d   :  { %v667_v55 = vpop.eup %666 }
 0xf1e   :  { %497 = vrot.lane.b32.xlu2 %v667_v55, %s759_s0 }
 0xf78   :  { %v498_v56 = vpop.permute.xlu2 %497 }
 0xf79   :  { %v500_v57 = vmul.f32 %v498_v56, %v481_v50 }
 0xf7b   :  { %504 = vrot.lane.b32.xlu0 %v500_v57, %s760_s1 }
 0xfed   :  { %v505_v58 = vpop.permute.xlu0 %504 }
 0xfee   :  { %602 = vmatmul.msk.f32.vlgmr.msrb.gmra.mxu3 %vm49_vm4, %v505_v58 }
0x1071   :  { %v525_v60 = vpop.f32.mrf.mxu3 }
0x1072   :  { %v528_v61 = vadd.f32 %v525_v60, %v502_v59 }
0x1074   :  { %668 = vtanh.f32 %v528_v61  ;;  %v603_v63 = vmul.f32 -1.442695, %v528_v61 }
0x1076   :  { %670 = vpow2.f32 %v603_v63 }
0x107a   :  { %v669_v62 = vpop.eup %668 }
0x107b   :  { %551 = vrot.lane.b32.xlu1 %v669_v62, %s759_s0 }
0x107c   :  { %v671_v0 = vpop.eup %670 }
0x107d   :  { %v532_v1 = vadd.f32 1.0, %v671_v0 }
0x107f   :  { %672 = vrcp.f32 %v532_v1  ;;  %v544_v7 = vand.u32 2147483648, %v532_v1  ;;  %vm538_vm15 = vweird.f32 %v532_v1  ;;  %v542_v8 = vand.u32 2147483647, %v532_v1 }
0x1081   :  { %v545_v10 = vor.u32 1.1754944e-38, %v544_v7  ;;  %vm543_vm1 = vcmp.eq.f32.partialorder %v542_v8, 8.507059e+37 }
0x1085   :  { %v673_v2 = vpop.eup %672 }
0x1086   :  { %v534_v3 = vmul.f32 %v673_v2, %v532_v1  ;;  %vm539_vm14 = vweird.f32 %v673_v2 }
0x1087   :  { %vm540_vm0 = vmor %vm538_vm15, %vm539_vm14 }
0x1088   :  { %v535_v4 = vsub.f32 1.0, %v534_v3 }
0x108a   :  { %v536_v5 = vmul.f32 %v673_v2, %v535_v4 }
0x108c   :  { %v537_v6 = vadd.f32 %v673_v2, %v536_v5 }
0x108e   :  { %v541_v9 = vsel %vm540_vm0, %v673_v2, %v537_v6 }
0x108f   :  { %v546_v12 = vsel %vm543_vm1, %v545_v10, %v541_v9 }
0x1090   :  { %v549_v14 = vmul.f32 %v546_v12, %v494_v54 }
0x10ed   :  { %v552_v11 = vpop.permute.xlu1 %551 }
0x10ee   :  { %v554_v13 = vmul.f32 %v552_v11, %v546_v12 }
0x10f0   :  { %556 = vrot.lane.b32.xlu2 %v554_v13, %s759_s0 }
0x114a   :  { %v557_v15 = vpop.permute.xlu2 %556 }
0x114b   :  { %v559_v16 = vadd.f32 %v557_v15, %v549_v14 }
0x114d   :  { %674 = vtanh.f32 %v559_v16 }
0x1153   :  { %v675_v17 = vpop.eup %674 }
0x1154   :  { %562 = vrot.lane.b32.xlu0 %v675_v17, %s759_s0 }
0x11c6   :  { %v563_v18 = vpop.permute.xlu0 %562 }
0x11c7   :  { %v565_v19 = vmul.f32 %v563_v18, %v546_v12 }
0x11c9   :  { %567 = vrot.lane.b32.xlu1 %v565_v19, %s760_s1 }
0x123b   :  { %v568_v20 = vpop.permute.xlu1 %567 }
0x123c   :  { %570 = vst.msk [vmem:[#allocation7] sm:$0xff] %vm49_vm4, %v568_v20 }
0x123d   :  { %581 = dma.vmem_to_hbm [thread:$0]  %s577_s22, 128, %s579_s25, [#allocation4]  }
0x123e   :  { %752 = dma.done.wait [#allocation4], 128  }
0x123f   :  { %753 = vsyncadd [#allocation4], 4294967168 }
0x1240   :  { %586 = vsyncpa [#allocation3], 1 }
0x1241   :  { %587 = vsyncpa [#allocation6], 1 }
0x1242   :  { %588 = vsyncpa [#allocation4], 1 }

</bundles_post_ra>
